<compile_context>
chip_gen: v6e
topology: v6e:2x2x1
jax: 0.10.0
libtpu: 0.0.40
codegen_flags: <defaults>
</compile_context>

<pallas_src>
import functools

import jax
import jax.numpy as jnp
from jax.experimental import pallas as pl
from jax.experimental.pallas import tpu as pltpu


# ----------------------------- fused Pallas kernel ---------------------------

def _gin3l_fused_kernel(
    a_ref, x_ref,
    w11_ref, b11_ref, w12_ref, b12_ref,   # conv1 MLP
    w21_ref, b21_ref, w22_ref, b22_ref,   # convs[0] MLP
    w31_ref, b31_ref, w32_ref, b32_ref,   # convs[1] MLP
    wf1_ref, bf1_ref, wf2_ref, bf2_ref,   # ffn
    o_ref, *, inv_n,
):
    a = a_ref[...]
    h = x_ref[...]

    # Three GIN layers, fully unrolled; h stays resident in VMEM/vregs.
    layers = (
        (w11_ref, b11_ref, w12_ref, b12_ref),
        (w21_ref, b21_ref, w22_ref, b22_ref),
        (w31_ref, b31_ref, w32_ref, b32_ref),
    )
    for (w1_ref, b1_ref, w2_ref, b2_ref) in layers:
        # Aggregation: A_hat @ h  (includes the (1+eps)*x_i self contribution).
        agg = jnp.dot(a, h, preferred_element_type=jnp.float32)
        # MLP: Linear -> ReLU -> Linear -> ReLU   (the GINConv's nn Sequential)
        t = jnp.dot(agg, w1_ref[...], preferred_element_type=jnp.float32) + b1_ref[...]
        t = jnp.maximum(t, 0.0)
        t = jnp.dot(t, w2_ref[...], preferred_element_type=jnp.float32) + b2_ref[...]
        h = jnp.maximum(t, 0.0)

    # GlobalMeanPool with batch == zeros: mean over all nodes -> [1, H].
    pooled = jnp.sum(h, axis=0, keepdims=True) * inv_n

    # FFN: Linear -> ReLU -> Dropout(identity in eval) -> Linear.
    f = jnp.dot(pooled, wf1_ref[...], preferred_element_type=jnp.float32) + bf1_ref[...]
    f = jnp.maximum(f, 0.0)
    o_ref[...] = jnp.dot(f, wf2_ref[...], preferred_element_type=jnp.float32) + bf2_ref[...]


def gin3l_fused(a_hat, x, gin_layers, ffn):
    """One pallas_call for the whole forward pass. All operands whole-array in VMEM."""
    n = x.shape[0]
    num_classes = ffn[2].shape[1]

    args = [a_hat, x]
    for layer in gin_layers:
        args.extend(layer)          # (w1, b1, w2, b2)
    args.extend(ffn)                # (wf1, bf1, wf2, bf2)

    vmem_spec = lambda: pl.BlockSpec(memory_space=pltpu.MemorySpace.VMEM)
    kernel = functools.partial(_gin3l_fused_kernel, inv_n=1.0 / float(n))

    return pl.pallas_call(
        kernel,
        out_shape=jax.ShapeDtypeStruct((1, num_classes), jnp.float32),
        in_specs=[vmem_spec() for _ in args],
        out_specs=vmem_spec(),
    )(*args)


# --------------------------------- glue --------------------------------------

def build_adjacency(edge_index, num_nodes, eps=0.0):
    """Dense A_hat matching the spec's GINConv reweight path:
    remove explicit self-loops, then add self-loops with weight (1 + eps)."""
    src = edge_index[0]
    dst = edge_index[1]
    non_self = (src != dst).astype(jnp.float32)
    a = jnp.zeros((num_nodes, num_nodes), dtype=jnp.float32)
    a = a.at[dst, src].add(non_self)  # message x_j flows src -> dst (sum aggr)
    a = a + (1.0 + eps) * jnp.eye(num_nodes, dtype=jnp.float32)
    return a


def init_linear(key, fan_in, fan_out):
    """PyTorch-style Linear init: U(-1/sqrt(fan_in), 1/sqrt(fan_in)).
    Weight stored as [in, out] so the kernel does X @ W."""
    kw, kb = jax.random.split(key)
    bound = 1.0 / jnp.sqrt(fan_in)
    w = jax.random.uniform(kw, (fan_in, fan_out), jnp.float32, -bound, bound)
    b = jax.random.uniform(kb, (1, fan_out), jnp.float32, -bound, bound)
    return w, b


@jax.jit
def gin_3l_forward(params, x, edge_index):
    n = x.shape[0]
    a_hat = build_adjacency(edge_index, n, eps=0.0)
    return gin3l_fused(a_hat, x, params["gin_layers"], params["ffn"])


# --------------------------------- main ---------------------------------------

if __name__ == "__main__":
    N = 16            # number of nodes
    E = 40            # number of directed edges
    DIM_NODE = 8
    DIM_HIDDEN = 32
    NUM_CLASSES = 3

    key = jax.random.PRNGKey(0)
    k_x, k_e, k_p = jax.random.split(key, 3)

    # Node features and a random directed edge list.
    x = jax.random.normal(k_x, (N, DIM_NODE), jnp.float32)
    edge_index = jax.random.randint(k_e, (2, E), 0, N, dtype=jnp.int32)

    # Parameters (deterministic).
    keys = jax.random.split(k_p, 8)
    gin_layers = []
    # conv1: Linear(dim_node, H), Linear(H, H)
    w1, b1 = init_linear(keys[0], DIM_NODE, DIM_HIDDEN)
    w2, b2 = init_linear(keys[1], DIM_HIDDEN, DIM_HIDDEN)
    gin_layers.append((w1, b1, w2, b2))
    # convs[0], convs[1]: Linear(H, H), Linear(H, H)
    for li in range(2):
        wa, ba = init_linear(keys[2 + 2 * li], DIM_HIDDEN, DIM_HIDDEN)
        wb, bb = init_linear(keys[3 + 2 * li], DIM_HIDDEN, DIM_HIDDEN)
        gin_layers.append((wa, ba, wb, bb))
    # ffn: Linear(H, H) -> ReLU -> Dropout -> Linear(H, num_classes)
    wf1, bf1 = init_linear(keys[6], DIM_HIDDEN, DIM_HIDDEN)
    wf2, bf2 = init_linear(keys[7], DIM_HIDDEN, NUM_CLASSES)

    params = {"gin_layers": tuple(gin_layers), "ffn": (wf1, bf1, wf2, bf2)}

    # TODO(synk): at realistic N, replace the dense A_hat @ X with a
    # scalar-prefetch / CSR-gather aggregation and tile the node axis
    # (grid 'parallel' for the v7x 2-TC split); bf16 operand casting with f32
    # accumulation is the MXU fast path on v6e/v7x when N/H scale up.

    out = gin_3l_forward(params, x, edge_index)
    jax.block_until_ready(out)
    assert out.shape == (1, NUM_CLASSES)
    print("KERNEL_OK")
</pallas_src>

<mosaic_0001>
module attributes {stable_mosaic.version = 11 : i64} {
  func.func private @main(%arg0: i32) attributes {dimension_semantics = [#tpu.dimension_semantics<core_parallel>], iteration_bounds = array<i64: 2>, tpu.core_type = #tpu.core_type<sc_scalar_subcore>, window_params = []} {
    return
  }
}

module attributes {stable_mosaic.version = 11 : i64} {
  func.func private @main(%arg0: i32) attributes {dimension_semantics = [#tpu.dimension_semantics<core_parallel>], iteration_bounds = array<i64: 2>, tpu.core_type = #tpu.core_type<sc_scalar_subcore>, window_params = []} {
    return
  }
}

module attributes {stable_mosaic.version = 11 : i64} {
  func.func @_gin3l_fused_kernel(%arg0: memref<16x16xf32, #tpu.memory_space<vmem>>, %arg1: memref<16x8xf32, #tpu.memory_space<vmem>>, %arg2: memref<8x32xf32, #tpu.memory_space<vmem>>, %arg3: memref<1x32xf32, #tpu.memory_space<vmem>>, %arg4: memref<32x32xf32, #tpu.memory_space<vmem>>, %arg5: memref<1x32xf32, #tpu.memory_space<vmem>>, %arg6: memref<32x32xf32, #tpu.memory_space<vmem>>, %arg7: memref<1x32xf32, #tpu.memory_space<vmem>>, %arg8: memref<32x32xf32, #tpu.memory_space<vmem>>, %arg9: memref<1x32xf32, #tpu.memory_space<vmem>>, %arg10: memref<32x32xf32, #tpu.memory_space<vmem>>, %arg11: memref<1x32xf32, #tpu.memory_space<vmem>>, %arg12: memref<32x32xf32, #tpu.memory_space<vmem>>, %arg13: memref<1x32xf32, #tpu.memory_space<vmem>>, %arg14: memref<32x32xf32, #tpu.memory_space<vmem>>, %arg15: memref<1x32xf32, #tpu.memory_space<vmem>>, %arg16: memref<32x3xf32, #tpu.memory_space<vmem>>, %arg17: memref<1x3xf32, #tpu.memory_space<vmem>>, %arg18: memref<1x3xf32, #tpu.memory_space<vmem>>) attributes {dimension_semantics = [], scalar_prefetch = 0 : i64, scratch_operands = 0 : i64, tpu.core_type = #tpu.core_type<tc>} {
    %c0 = arith.constant 0 : index
    %c0_0 = arith.constant 0 : index
    %0 = vector.load %arg0[%c0, %c0_0] : memref<16x16xf32, #tpu.memory_space<vmem>>, vector<16x16xf32>
    %c0_1 = arith.constant 0 : index
    %c0_2 = arith.constant 0 : index
    %1 = vector.load %arg1[%c0_1, %c0_2] : memref<16x8xf32, #tpu.memory_space<vmem>>, vector<16x8xf32>
    %cst = arith.constant dense<0.000000e+00> : vector<16x8xf32>
    %2 = tpu.matmul %0, %1, %cst {dimension_numbers = #tpu.dot_dimension_numbers<[1], [0], [0], [1], [0, 0, 1, 1], [], []>} : vector<16x16xf32>, vector<16x8xf32>, vector<16x8xf32> -> vector<16x8xf32>
    %c0_3 = arith.constant 0 : index
    %c0_4 = arith.constant 0 : index
    %3 = vector.load %arg2[%c0_3, %c0_4] : memref<8x32xf32, #tpu.memory_space<vmem>>, vector<8x32xf32>
    %cst_5 = arith.constant dense<0.000000e+00> : vector<16x32xf32>
    %4 = tpu.matmul %2, %3, %cst_5 {dimension_numbers = #tpu.dot_dimension_numbers<[1], [0], [0], [1], [0, 0, 1, 1], [], []>} : vector<16x8xf32>, vector<8x32xf32>, vector<16x32xf32> -> vector<16x32xf32>
    %c0_6 = arith.constant 0 : index
    %c0_7 = arith.constant 0 : index
    %5 = vector.load %arg3[%c0_6, %c0_7] : memref<1x32xf32, #tpu.memory_space<vmem>>, vector<1x32xf32>
    %6 = vector.broadcast %5 : vector<1x32xf32> to vector<16x32xf32>
    %7 = arith.addf %4, %6 : vector<16x32xf32>
    %cst_8 = arith.constant 0.000000e+00 : f32
    %8 = vector.broadcast %cst_8 : f32 to vector<16x32xf32>
    %9 = arith.maximumf %7, %8 : vector<16x32xf32>
    %c0_9 = arith.constant 0 : index
    %c0_10 = arith.constant 0 : index
    %10 = vector.load %arg4[%c0_9, %c0_10] : memref<32x32xf32, #tpu.memory_space<vmem>>, vector<32x32xf32>
    %cst_11 = arith.constant dense<0.000000e+00> : vector<16x32xf32>
    %11 = tpu.matmul %9, %10, %cst_11 {dimension_numbers = #tpu.dot_dimension_numbers<[1], [0], [0], [1], [0, 0, 1, 1], [], []>} : vector<16x32xf32>, vector<32x32xf32>, vector<16x32xf32> -> vector<16x32xf32>
    %c0_12 = arith.constant 0 : index
    %c0_13 = arith.constant 0 : index
    %12 = vector.load %arg5[%c0_12, %c0_13] : memref<1x32xf32, #tpu.memory_space<vmem>>, vector<1x32xf32>
    %13 = vector.broadcast %12 : vector<1x32xf32> to vector<16x32xf32>
    %14 = arith.addf %11, %13 : vector<16x32xf32>
    %cst_14 = arith.constant 0.000000e+00 : f32
    %15 = vector.broadcast %cst_14 : f32 to vector<16x32xf32>
    %16 = arith.maximumf %14, %15 : vector<16x32xf32>
    %cst_15 = arith.constant dense<0.000000e+00> : vector<16x32xf32>
    %17 = tpu.matmul %0, %16, %cst_15 {dimension_numbers = #tpu.dot_dimension_numbers<[1], [0], [0], [1], [0, 0, 1, 1], [], []>} : vector<16x16xf32>, vector<16x32xf32>, vector<16x32xf32> -> vector<16x32xf32>
    %c0_16 = arith.constant 0 : index
    %c0_17 = arith.constant 0 : index
    %18 = vector.load %arg6[%c0_16, %c0_17] : memref<32x32xf32, #tpu.memory_space<vmem>>, vector<32x32xf32>
    %cst_18 = arith.constant dense<0.000000e+00> : vector<16x32xf32>
    %19 = tpu.matmul %17, %18, %cst_18 {dimension_numbers = #tpu.dot_dimension_numbers<[1], [0], [0], [1], [0, 0, 1, 1], [], []>} : vector<16x32xf32>, vector<32x32xf32>, vector<16x32xf32> -> vector<16x32xf32>
    %c0_19 = arith.constant 0 : index
    %c0_20 = arith.constant 0 : index
    %20 = vector.load %arg7[%c0_19, %c0_20] : memref<1x32xf32, #tpu.memory_space<vmem>>, vector<1x32xf32>
    %21 = vector.broadcast %20 : vector<1x32xf32> to vector<16x32xf32>
    %22 = arith.addf %19, %21 : vector<16x32xf32>
    %cst_21 = arith.constant 0.000000e+00 : f32
    %23 = vector.broadcast %cst_21 : f32 to vector<16x32xf32>
    %24 = arith.maximumf %22, %23 : vector<16x32xf32>
    %c0_22 = arith.constant 0 : index
    %c0_23 = arith.constant 0 : index
    %25 = vector.load %arg8[%c0_22, %c0_23] : memref<32x32xf32, #tpu.memory_space<vmem>>, vector<32x32xf32>
    %cst_24 = arith.constant dense<0.000000e+00> : vector<16x32xf32>
    %26 = tpu.matmul %24, %25, %cst_24 {dimension_numbers = #tpu.dot_dimension_numbers<[1], [0], [0], [1], [0, 0, 1, 1], [], []>} : vector<16x32xf32>, vector<32x32xf32>, vector<16x32xf32> -> vector<16x32xf32>
    %c0_25 = arith.constant 0 : index
    %c0_26 = arith.constant 0 : index
    %27 = vector.load %arg9[%c0_25, %c0_26] : memref<1x32xf32, #tpu.memory_space<vmem>>, vector<1x32xf32>
    %28 = vector.broadcast %27 : vector<1x32xf32> to vector<16x32xf32>
    %29 = arith.addf %26, %28 : vector<16x32xf32>
    %cst_27 = arith.constant 0.000000e+00 : f32
    %30 = vector.broadcast %cst_27 : f32 to vector<16x32xf32>
    %31 = arith.maximumf %29, %30 : vector<16x32xf32>
    %cst_28 = arith.constant dense<0.000000e+00> : vector<16x32xf32>
    %32 = tpu.matmul %0, %31, %cst_28 {dimension_numbers = #tpu.dot_dimension_numbers<[1], [0], [0], [1], [0, 0, 1, 1], [], []>} : vector<16x16xf32>, vector<16x32xf32>, vector<16x32xf32> -> vector<16x32xf32>
    %c0_29 = arith.constant 0 : index
    %c0_30 = arith.constant 0 : index
    %33 = vector.load %arg10[%c0_29, %c0_30] : memref<32x32xf32, #tpu.memory_space<vmem>>, vector<32x32xf32>
    %cst_31 = arith.constant dense<0.000000e+00> : vector<16x32xf32>
    %34 = tpu.matmul %32, %33, %cst_31 {dimension_numbers = #tpu.dot_dimension_numbers<[1], [0], [0], [1], [0, 0, 1, 1], [], []>} : vector<16x32xf32>, vector<32x32xf32>, vector<16x32xf32> -> vector<16x32xf32>
    %c0_32 = arith.constant 0 : index
    %c0_33 = arith.constant 0 : index
    %35 = vector.load %arg11[%c0_32, %c0_33] : memref<1x32xf32, #tpu.memory_space<vmem>>, vector<1x32xf32>
    %36 = vector.broadcast %35 : vector<1x32xf32> to vector<16x32xf32>
    %37 = arith.addf %34, %36 : vector<16x32xf32>
    %cst_34 = arith.constant 0.000000e+00 : f32
    %38 = vector.broadcast %cst_34 : f32 to vector<16x32xf32>
    %39 = arith.maximumf %37, %38 : vector<16x32xf32>
    %c0_35 = arith.constant 0 : index
    %c0_36 = arith.constant 0 : index
    %40 = vector.load %arg12[%c0_35, %c0_36] : memref<32x32xf32, #tpu.memory_space<vmem>>, vector<32x32xf32>
    %cst_37 = arith.constant dense<0.000000e+00> : vector<16x32xf32>
    %41 = tpu.matmul %39, %40, %cst_37 {dimension_numbers = #tpu.dot_dimension_numbers<[1], [0], [0], [1], [0, 0, 1, 1], [], []>} : vector<16x32xf32>, vector<32x32xf32>, vector<16x32xf32> -> vector<16x32xf32>
    %c0_38 = arith.constant 0 : index
    %c0_39 = arith.constant 0 : index
    %42 = vector.load %arg13[%c0_38, %c0_39] : memref<1x32xf32, #tpu.memory_space<vmem>>, vector<1x32xf32>
    %43 = vector.broadcast %42 : vector<1x32xf32> to vector<16x32xf32>
    %44 = arith.addf %41, %43 : vector<16x32xf32>
    %cst_40 = arith.constant 0.000000e+00 : f32
    %45 = vector.broadcast %cst_40 : f32 to vector<16x32xf32>
    %46 = arith.maximumf %44, %45 : vector<16x32xf32>
    %cst_41 = arith.constant dense<0.000000e+00> : vector<32xf32>
    %47 = vector.multi_reduction <add>, %46, %cst_41 [0] : vector<16x32xf32> to vector<32xf32>
    %48 = vector.shape_cast %47 : vector<32xf32> to vector<1x32xf32>
    %cst_42 = arith.constant 6.250000e-02 : f32
    %49 = vector.broadcast %cst_42 : f32 to vector<1x32xf32>
    %50 = arith.mulf %48, %49 : vector<1x32xf32>
    %c0_43 = arith.constant 0 : index
    %c0_44 = arith.constant 0 : index
    %51 = vector.load %arg14[%c0_43, %c0_44] : memref<32x32xf32, #tpu.memory_space<vmem>>, vector<32x32xf32>
    %cst_45 = arith.constant dense<0.000000e+00> : vector<1x32xf32>
    %52 = tpu.matmul %50, %51, %cst_45 {dimension_numbers = #tpu.dot_dimension_numbers<[1], [0], [0], [1], [0, 0, 1, 1], [], []>} : vector<1x32xf32>, vector<32x32xf32>, vector<1x32xf32> -> vector<1x32xf32>
    %c0_46 = arith.constant 0 : index
    %c0_47 = arith.constant 0 : index
    %53 = vector.load %arg15[%c0_46, %c0_47] : memref<1x32xf32, #tpu.memory_space<vmem>>, vector<1x32xf32>
    %54 = arith.addf %52, %53 : vector<1x32xf32>
    %cst_48 = arith.constant 0.000000e+00 : f32
    %55 = vector.broadcast %cst_48 : f32 to vector<1x32xf32>
    %56 = arith.maximumf %54, %55 : vector<1x32xf32>
    %c0_49 = arith.constant 0 : index
    %c0_50 = arith.constant 0 : index
    %57 = vector.load %arg16[%c0_49, %c0_50] : memref<32x3xf32, #tpu.memory_space<vmem>>, vector<32x3xf32>
    %cst_51 = arith.constant dense<0.000000e+00> : vector<1x3xf32>
    %58 = tpu.matmul %56, %57, %cst_51 {dimension_numbers = #tpu.dot_dimension_numbers<[1], [0], [0], [1], [0, 0, 1, 1], [], []>} : vector<1x32xf32>, vector<32x3xf32>, vector<1x3xf32> -> vector<1x3xf32>
    %c0_52 = arith.constant 0 : index
    %c0_53 = arith.constant 0 : index
    %59 = vector.load %arg17[%c0_52, %c0_53] : memref<1x3xf32, #tpu.memory_space<vmem>>, vector<1x3xf32>
    %60 = arith.addf %58, %59 : vector<1x3xf32>
    %c0_54 = arith.constant 0 : index
    %c0_55 = arith.constant 0 : index
    %61 = vector.load %arg18[%c0_54, %c0_55] : memref<1x3xf32, #tpu.memory_space<vmem>>, vector<1x3xf32>
    tpu.vector_store %arg18[%c0_54, %c0_55], %60 {strides = array<i32>} : memref<1x3xf32, #tpu.memory_space<vmem>>, vector<1x3xf32>,
    return
  }
}

</mosaic_0001>

<bundles_post_ra>
// kernel: gin_3l_forward.1
= control target key start
LH: loop header
LB: loop body
LE: loop exit
PB: predicated region body
PF: predicated region fallthrough
CT: control target
= control target key end

     0   :  { %s1545_s0 = inlined_call_operand.hbm [shape: f32[16,16], index: 0, kind: input, shape index: {}]   ;;  %s1546_s1 = inlined_call_operand.vmem [shape: f32[16,8], index: 1, kind: input, shape index: {}]   ;;  %s1547_s2 = inlined_call_operand.vmem [shape: f32[8,32], index: 2, kind: input, shape index: {}]   ;;  %s1548_s3 = inlined_call_operand.vmem [shape: f32[1,32], index: 3, kind: input, shape index: {}]   ;;  %s1549_s4 = inlined_call_operand.vmem [shape: f32[32,32], index: 4, kind: input, shape index: {}]   ;;  %s1550_s5 = inlined_call_operand.vmem [shape: f32[1,32], index: 5, kind: input, shape index: {}]   ;;  %s1551_s6 = inlined_call_operand.vmem [shape: f32[32,32], index: 6, kind: input, shape index: {}]   ;;  %s1552_s7 = inlined_call_operand.vmem [shape: f32[1,32], index: 7, kind: input, shape index: {}]   ;;  %s1553_s8 = inlined_call_operand.vmem [shape: f32[32,32], index: 8, kind: input, shape index: {}]   ;;  %s1554_s9 = inlined_call_operand.vmem [shape: f32[1,32], index: 9, kind: input, shape index: {}]   ;;  %s1555_s10 = inlined_call_operand.vmem [shape: f32[32,32], index: 10, kind: input, shape index: {}]   ;;  %s1556_s11 = inlined_call_operand.vmem [shape: f32[1,32], index: 11, kind: input, shape index: {}]   ;;  %s1557_s12 = inlined_call_operand.vmem [shape: f32[32,32], index: 12, kind: input, shape index: {}]   ;;  %s1558_s13 = inlined_call_operand.vmem [shape: f32[1,32], index: 13, kind: input, shape index: {}]   ;;  %s1559_s14 = inlined_call_operand.vmem [shape: f32[32,32], index: 14, kind: input, shape index: {}]   ;;  %s1560_s15 = inlined_call_operand.vmem [shape: f32[1,32], index: 15, kind: input, shape index: {}]   ;;  %s1561_s16 = inlined_call_operand.vmem [shape: f32[32,3], index: 16, kind: input, shape index: {}]   ;;  %s1562_s17 = inlined_call_operand.vmem [shape: f32[1,3], index: 17, kind: input, shape index: {}]   ;;  %s1563_s18 = inlined_call_operand.hbm [shape: f32[1,3], index: 18, kind: output, shape index: {}]  }
   0x1   :  { %1565 = sst [smem:[#allocation8_spill]] %s1545_s0 }
   0x2   :  { %1566 = sst [smem:[#allocation9_spill]] %s1546_s1 }
   0x3   :  { %1567 = sst [smem:[#allocation10_spill]] %s1547_s2 }
   0x4   :  { %23 = vsyncpa [#allocation3], 0 }
   0x5   :  { %24 = vsyncpa [#allocation4], 0  ;;  %s1291_s27 = smov [#allocation2]  }
   0x6   :  { %s30_s28 = sshll.u32 %s1291_s27, 4  ;;  %s31_s28 = int_to_ptr.vmem [resolvable:$true] %s30_s28 }
   0x7   :  { %s1255_s29 = scalar_lea.vmem %s31_s28, 256  ;;  %p1260_p1 = scmp.lt.s32.totalorder %s31_s28, %s31_s28 }
   0x8   :  { %p1256_p0 = scmp.ne.s32.totalorder %s31_s28, %s1255_s29  ;;  %p1261_p2 = scmp.lt.s32.totalorder %s1255_s29, %s1255_s29 }
   0xa   :  { %p1262_p3 = por %p1261_p2, %p1260_p1 }
   0xc   :  { %p1263_p4 = pnand %p1262_p3, %p1256_p0 }
   0xe   :  { %1266 = shalt.err (!%p1263_p4)
}
   0xf   :  { %s1292_s30 = smov 128   ;;  %s1293_s0 = smov 8  }
  0x10   :  { %s1568_s20 = sld [smem:[#allocation8_spill]] }
  0x16   :  { %36 = dma.hbm_to_vmem [thread:$0]  %s1568_s20, 256, %s31_s28, [#allocation3], %s1292_s30, %s1292_s30, %s1293_s0  }
  0x17   :  { %1287 = dma.done.wait [#allocation3], 256  }
  0x18   :  { %1288 = vsyncadd [#allocation3], 4294967040  ;;  %vm78_vm0 = vcmask 130048   ;;  %s1569_s2 = sld [smem:[#allocation9_spill]]  ;;  %v1401_v2 = vld [vmem:[#allocation2] sm:$0xff]  ;;  %v1405_v3 = vld [vmem:[#allocation2 + $0x8] sm:$0xff] }
  0x19   :  { %1142 = vmatprep.mubr.msk.f32.mxu0 %vm78_vm0, %v1401_v2  ;;  %s1570_s27 = sld [smem:[#allocation10_spill]]  ;;  %vm168_vm1 = vcmask 64512   ;;  %v255_v7 = vld [vmem:[%s1549_s4 + $0x18] sm:$0xff]  ;;  %v254_v8 = vld [vmem:[%s1549_s4 + $0x10] sm:$0xff]  ;;  %v253_v9 = vld [vmem:[%s1549_s4 + $0x8] sm:$0xff]  ;;  %vm263_vm2 = vcmask 261120  }
  0x1a   :  { %v252_v10 = vld [vmem:[%s1549_s4] sm:$0xff]  ;;  %v425_v25 = vld [vmem:[%s1551_s6 + $0x18] sm:$0xff]  ;;  %v424_v26 = vld [vmem:[%s1551_s6 + $0x10] sm:$0xff]  ;;  %vm1295_vm3 = vmmov 0   ;;  %s1296_s19 = smov [#allocation5]   ;;  %vm1040_vm4 = vcmask 16384  }
  0x1b   :  { %v1059_v11 = vld [vmem:[%s1548_s3] ss:$0 sm:$0xff]  ;;  %v423_v27 = vld [vmem:[%s1551_s6 + $0x8] sm:$0xff]  ;;  %v519_v31 = vld [vmem:[%s1553_s8 + $0x18] sm:$0xff]  ;;  %s1048_s1 = sshll.u32 %s1296_s19, 4  ;;  %s1049_s1 = int_to_ptr.vmem [resolvable:$true] %s1048_s1 }
  0x1c   :  { %v1062_v18 = vld [vmem:[%s1550_s5] ss:$0 sm:$0xff]  ;;  %v518_v32 = vld [vmem:[%s1553_s8 + $0x10] sm:$0xff]  ;;  %v517_v33 = vld [vmem:[%s1553_s8 + $0x8] sm:$0xff]  ;;  %p1272_p6 = scmp.lt.s32.totalorder %s1049_s1, %s1049_s1 }
  0x1d   :  { %v422_v28 = vld [vmem:[%s1551_s6] sm:$0xff]  ;;  %v688_v42 = vld [vmem:[%s1555_s10 + $0x18] sm:$0xff]  ;;  %v687_v43 = vld [vmem:[%s1555_s10 + $0x10] sm:$0xff] }
  0x1e   :  { %v77_v0 = vld [vmem:[%s1569_s2 + $0x8] sm:$0xff]  ;;  %v76_v1 = vld [vmem:[%s1569_s2] sm:$0xff]  ;;  %v782_v55 = vld [vmem:[%s1557_s12 + $0x18] sm:$0xff] }
  0x1f   :  { %1138 = vmatprep.subr.mxu0 %v77_v0  ;;  %v160_v4 = vld [vmem:[%s1570_s27] sm:$0xff]  ;;  %v686_v51 = vld [vmem:[%s1555_s10 + $0x8] sm:$0xff]  ;;  %v781_v56 = vld [vmem:[%s1557_s12 + $0x10] sm:$0xff] }
  0x20   :  { %1139 = vmatpush3.msra.mxu0 %v77_v0  ;;  %1145 = vmatprep.subr.mxu1 %v160_v4  ;;  %v516_v34 = vld [vmem:[%s1553_s8] sm:$0xff]  ;;  %v780_v57 = vld [vmem:[%s1557_s12 + $0x8] sm:$0xff] }
  0x21   :  { %1140 = vmatprep.subr.mxu0 %v76_v1  ;;  %1146 = vmatpush3.msra.mxu1 %v160_v4  ;;  %v1067_v35 = vld [vmem:[%s1552_s7] ss:$0 sm:$0xff]  ;;  %v885_v4 = vld [vmem:[%s1559_s14 + $0x10] sm:$0xff] }
  0x22   :  { %1141 = vmatpush3.msra.mxu0 %v76_v1  ;;  %1150 = vmatprep.subr.mxu1 %v255_v7  ;;  %v1070_v44 = vld [vmem:[%s1554_s9] ss:$0 sm:$0xff] }
  0x23   :  { %1143 = vmatmul.mubr.msk.f32.vlgmr.msra.gmra.mxu0 %vm78_vm0, %v1405_v3  ;;  %v685_v52 = vld [vmem:[%s1555_s10] sm:$0xff] }
  0x24   :  { %1165 = vmatprep.mubr.msk.f32.mxu0 %vm78_vm0, %v1401_v2  ;;  %v779_v58 = vld [vmem:[%s1557_s12] sm:$0xff] }
  0x25   :  { %v1075_v59 = vld [vmem:[%s1556_s11] ss:$0 sm:$0xff] }
  0xe3   :  { %v1144_v5 = vpop.f32.mrf.mxu0 }
  0xe5   :  { %v151_v6 = vpop.f32.mrf.mxu0 }
  0xe6   :  { %1147 = vmatprep.mubr.msk.f32.mxu1 %vm168_vm1, %v151_v6  ;;  %v883_v6 = vld [vmem:[%s1559_s14] sm:$0xff] }
  0xe7   :  { %1148 = vmatmul.mubr.msk.f32.vlgmr.msra.gmra.mxu1 %vm168_vm1, %v1144_v5  ;;  %v884_v5 = vld [vmem:[%s1559_s14 + $0x8] sm:$0xff] }
  0xe8   :  { %1151 = vmatpush3.msra.mxu1 %v255_v7  ;;  %v965_v7 = vld [vmem:[%s1561_s16 + $0x18] sm:$0xff] }
  0xe9   :  { %1152 = vmatprep.subr.mxu1 %v254_v8 }
  0xea   :  { %1153 = vmatpush3.msra.mxu1 %v254_v8  ;;  %v1078_v8 = vld [vmem:[%s1558_s13] ss:$0 sm:$0xff] }
  0xeb   :  { %1154 = vmatprep.subr.mxu1 %v253_v9 }
  0xec   :  { %1155 = vmatpush3.msra.mxu1 %v253_v9 }
  0xed   :  { %1156 = vmatprep.subr.mxu1 %v252_v10 }
  0xee   :  { %1157 = vmatpush3.msra.mxu1 %v252_v10 }
  0xef   :  { %1179 = vmatprep.subr.mxu1 %v519_v31 }
 0x1a7   :  { %v1149_v12 = vpop.f32.mrf.mxu1 }
 0x1a8   :  { %v247_v13 = vadd.f32 %v1149_v12, %v1059_v11 }
 0x1a9   :  { %v241_v14 = vpop.f32.mrf.mxu1 }
 0x1aa   :  { %v242_v15 = vadd.f32 %v1059_v11, %v241_v14  ;;  %v251_v17 = vmax.f32 %v247_v13, 0.0 }
 0x1ac   :  { %v250_v16 = vmax.f32 %v242_v15, 0.0 }
 0x1ae   :  { %1158 = vmatprep.mubr.msk.f32.mxu1 %vm263_vm2, %v250_v16 }
 0x1af   :  { %1159 = vmatmul.mubr.msk.f32.vlgmr.msra.gmra.mxu1 %vm263_vm2, %v251_v17 }
 0x1b0   :  { %1180 = vmatpush3.msra.mxu1 %v519_v31 }
 0x1b1   :  { %1181 = vmatprep.subr.mxu1 %v518_v32 }
 0x1b2   :  { %1182 = vmatpush3.msra.mxu1 %v518_v32 }
 0x1b3   :  { %1183 = vmatprep.subr.mxu1 %v517_v33 }
 0x1b4   :  { %1184 = vmatpush3.msra.mxu1 %v517_v33  ;;  %v966_v33 = vld [vmem:[%s1562_s17] sm:$0x1] }
 0x1b5   :  { %1185 = vmatprep.subr.mxu1 %v516_v34 }
 0x1b6   :  { %1186 = vmatpush3.msra.mxu1 %v516_v34 }
 0x1b7   :  { %1197 = vmatprep.subr.mxu1 %v688_v42 }
 0x26f   :  { %v1160_v19 = vpop.f32.mrf.mxu1 }
 0x270   :  { %v342_v20 = vadd.f32 %v1160_v19, %v1062_v18 }
 0x271   :  { %v336_v21 = vpop.f32.mrf.mxu1 }
 0x272   :  { %v346_v22 = vmax.f32 %v342_v20, 0.0  ;;  %v337_v23 = vadd.f32 %v1062_v18, %v336_v21 }
 0x274   :  { %v345_v24 = vmax.f32 %v337_v23, 0.0  ;;  %1161 = vmatprep.subr.mxu0 %v346_v22 }
 0x275   :  { %1162 = vmatpush3.msra.mxu0 %v346_v22 }
 0x276   :  { %1163 = vmatprep.subr.mxu0 %v345_v24 }
 0x277   :  { %1164 = vmatpush3.msra.mxu0 %v345_v24 }
 0x278   :  { %1166 = vmatmul.mubr.msk.f32.vlgmr.msra.gmra.mxu0 %vm78_vm0, %v1405_v3  ;;  %1168 = vmatprep.subr.mxu0 %v425_v25 }
 0x279   :  { %1169 = vmatpush3.msra.mxu0 %v425_v25  ;;  %v964_v25 = vld [vmem:[%s1561_s16 + $0x10] sm:$0xff] }
 0x27a   :  { %1170 = vmatprep.subr.mxu0 %v424_v26 }
 0x27b   :  { %1171 = vmatpush3.msra.mxu0 %v424_v26  ;;  %v963_v26 = vld [vmem:[%s1561_s16 + $0x8] sm:$0xff] }
 0x27c   :  { %1172 = vmatprep.subr.mxu0 %v423_v27 }
 0x27d   :  { %1173 = vmatpush3.msra.mxu0 %v423_v27  ;;  %v962_v27 = vld [vmem:[%s1561_s16] sm:$0xff]  ;;  %s1267_s16 = scalar_lea.vmem %s1049_s1, 16 }
 0x27e   :  { %1174 = vmatprep.subr.mxu0 %v422_v28  ;;  %p1268_p5 = scmp.ne.s32.totalorder %s1049_s1, %s1267_s16 }
 0x27f   :  { %1175 = vmatpush3.msra.mxu0 %v422_v28  ;;  %v887_v28 = vld [vmem:[%s1560_s15] sm:$0x1]  ;;  %s1271_s15 = scalar_lea.vmem %s1049_s1, 32 }
 0x280   :  { %p1273_p7 = scmp.lt.s32.totalorder %s1271_s15, %s1267_s16 }
 0x282   :  { %p1274_p8 = por %p1273_p7, %p1272_p6 }
 0x284   :  { %p1275_p9 = pnand %p1274_p8, %p1268_p5 }
 0x338   :  { %v1167_v29 = vpop.f32.mrf.mxu0 }
 0x33a   :  { %v413_v30 = vpop.f32.mrf.mxu0 }
 0x33b   :  { %1176 = vmatprep.mubr.msk.f32.mxu0 %vm263_vm2, %v413_v30 }
 0x33c   :  { %1177 = vmatmul.mubr.msk.f32.vlgmr.msra.gmra.mxu0 %vm263_vm2, %v1167_v29 }
 0x33d   :  { %1194 = vmatprep.mubr.msk.f32.mxu0 %vm78_vm0, %v1401_v2  ;;  %v1294_v2 = vmov 0.0  }
 0x3fc   :  { %v1178_v36 = vpop.f32.mrf.mxu0 }
 0x3fd   :  { %v511_v37 = vadd.f32 %v1178_v36, %v1067_v35 }
 0x3fe   :  { %v505_v38 = vpop.f32.mrf.mxu0 }
 0x3ff   :  { %v506_v39 = vadd.f32 %v1067_v35, %v505_v38  ;;  %v515_v41 = vmax.f32 %v511_v37, 0.0 }
 0x401   :  { %v514_v40 = vmax.f32 %v506_v39, 0.0 }
 0x403   :  { %1187 = vmatprep.mubr.msk.f32.mxu1 %vm263_vm2, %v514_v40 }
 0x404   :  { %1188 = vmatmul.mubr.msk.f32.vlgmr.msra.gmra.mxu1 %vm263_vm2, %v515_v41 }
 0x405   :  { %1198 = vmatpush3.msra.mxu1 %v688_v42 }
 0x406   :  { %1199 = vmatprep.subr.mxu1 %v687_v43 }
 0x407   :  { %1200 = vmatpush3.msra.mxu1 %v687_v43 }
 0x408   :  { %1201 = vmatprep.subr.mxu1 %v686_v51 }
 0x409   :  { %1202 = vmatpush3.msra.mxu1 %v686_v51 }
 0x40a   :  { %1203 = vmatprep.subr.mxu1 %v685_v52 }
 0x40b   :  { %1204 = vmatpush3.msra.mxu1 %v685_v52 }
 0x40c   :  { %1219 = vmatprep.subr.mxu1 %v1294_v2 }
 0x4c4   :  { %v1189_v45 = vpop.f32.mrf.mxu1 }
 0x4c5   :  { %v605_v46 = vadd.f32 %v1189_v45, %v1070_v44 }
 0x4c6   :  { %v599_v47 = vpop.f32.mrf.mxu1 }
 0x4c7   :  { %v609_v48 = vmax.f32 %v605_v46, 0.0  ;;  %v600_v49 = vadd.f32 %v1070_v44, %v599_v47 }
 0x4c9   :  { %v608_v50 = vmax.f32 %v600_v49, 0.0  ;;  %1190 = vmatprep.subr.mxu0 %v609_v48 }
 0x4ca   :  { %1191 = vmatpush3.msra.mxu0 %v609_v48 }
 0x4cb   :  { %1192 = vmatprep.subr.mxu0 %v608_v50 }
 0x4cc   :  { %1193 = vmatpush3.msra.mxu0 %v608_v50 }
 0x4cd   :  { %1195 = vmatmul.mubr.msk.f32.vlgmr.msra.gmra.mxu0 %vm78_vm0, %v1405_v3  ;;  %1208 = vmatprep.subr.mxu0 %v782_v55  ;;  %v886_v3 = vld [vmem:[%s1559_s14 + $0x18] sm:$0xff] }
 0x4ce   :  { %1209 = vmatpush3.msra.mxu0 %v782_v55 }
 0x4cf   :  { %1210 = vmatprep.subr.mxu0 %v781_v56 }
 0x4d0   :  { %1211 = vmatpush3.msra.mxu0 %v781_v56 }
 0x4d1   :  { %1212 = vmatprep.subr.mxu0 %v780_v57 }
 0x4d2   :  { %1213 = vmatpush3.msra.mxu0 %v780_v57 }
 0x4d3   :  { %1214 = vmatprep.subr.mxu0 %v779_v58 }
 0x4d4   :  { %1215 = vmatpush3.msra.mxu0 %v779_v58 }
 0x4d5   :  { %1230 = vmatprep.subr.mxu0 %v1294_v2 }
 0x58d   :  { %v1196_v53 = vpop.f32.mrf.mxu0 }
 0x58f   :  { %v676_v54 = vpop.f32.mrf.mxu0 }
 0x590   :  { %1205 = vmatprep.mubr.msk.f32.mxu1 %vm263_vm2, %v676_v54 }
 0x591   :  { %1206 = vmatmul.mubr.msk.f32.vlgmr.msra.gmra.mxu1 %vm263_vm2, %v1196_v53 }
 0x592   :  { %1220 = vmatpush3.msra.mxu1 %v886_v3  ;;  %1227 = vmatprep.mubr.msk.f32.mxu1 %vm1295_vm3, %v1294_v2 }
 0x593   :  { %1221 = vmatprep.subr.mxu1 %v1294_v2 }
 0x594   :  { %1222 = vmatpush3.msra.mxu1 %v885_v4 }
 0x595   :  { %1223 = vmatprep.subr.mxu1 %v1294_v2 }
 0x596   :  { %1224 = vmatpush3.msra.mxu1 %v884_v5 }
 0x597   :  { %1225 = vmatprep.subr.mxu1 %v1294_v2 }
 0x598   :  { %1226 = vmatpush3.msra.mxu1 %v883_v6 }
 0x651   :  { %v1207_v60 = vpop.f32.mrf.mxu1 }
 0x652   :  { %v774_v61 = vadd.f32 %v1207_v60, %v1075_v59 }
 0x653   :  { %v768_v62 = vpop.f32.mrf.mxu1 }
 0x654   :  { %v769_v63 = vadd.f32 %v1075_v59, %v768_v62  ;;  %v778_v1 = vmax.f32 %v774_v61, 0.0 }
 0x656   :  { %v777_v0 = vmax.f32 %v769_v63, 0.0 }
 0x658   :  { %1216 = vmatprep.mubr.msk.f32.mxu0 %vm263_vm2, %v777_v0 }
 0x659   :  { %1217 = vmatmul.mubr.msk.f32.vlgmr.msra.gmra.mxu0 %vm263_vm2, %v778_v1 }
 0x65a   :  { %1238 = vmatprep.mubr.msk.f32.mxu0 %vm1295_vm3, %v1294_v2  ;;  %1231 = vmatpush3.msra.mxu0 %v965_v7 }
 0x65b   :  { %1232 = vmatprep.subr.mxu0 %v1294_v2 }
 0x65c   :  { %1233 = vmatpush3.msra.mxu0 %v964_v25 }
 0x65d   :  { %1234 = vmatprep.subr.mxu0 %v1294_v2 }
 0x65e   :  { %1235 = vmatpush3.msra.mxu0 %v963_v26 }
 0x65f   :  { %1236 = vmatprep.subr.mxu0 %v1294_v2 }
 0x660   :  { %1237 = vmatpush3.msra.mxu0 %v962_v27 }
 0x719   :  { %v1218_v9 = vpop.f32.mrf.mxu0 }
 0x71a   :  { %v868_v10 = vadd.f32 %v1218_v9, %v1078_v8 }
 0x71b   :  { %v862_v11 = vpop.f32.mrf.mxu0 }
 0x71c   :  { %v872_v12 = vmax.f32 %v868_v10, 0.0  ;;  %v863_v13 = vadd.f32 %v1078_v8, %v862_v11 }
 0x71e   :  { %v871_v14 = vmax.f32 %v863_v13, 0.0  ;;  %v874_v15 = vsel %vm263_vm2, %v872_v12, 0.0 }
 0x720   :  { %v873_v16 = vsel %vm263_vm2, %v871_v14, 0.0 }
 0x721   :  { %v875_v17 = vadd.f32 %v874_v15, %v873_v16 }
 0x723   :  { %v876_v18 = vrot.slane %v875_v17, 4 }
 0x725   :  { %v877_v19 = vadd.f32 %v876_v18, %v875_v17 }
 0x727   :  { %v878_v20 = vrot.slane %v877_v19, 2 }
 0x729   :  { %v879_v21 = vadd.f32 %v878_v20, %v877_v19 }
 0x72b   :  { %v880_v22 = vrot.slane %v879_v21, 1 }
 0x72d   :  { %v881_v23 = vadd.f32 %v880_v22, %v879_v21 }
 0x72f   :  { %v882_v24 = vmul.f32 0.0625, %v881_v23 }
 0x731   :  { %1228 = vmatmul.mubr.msk.f32.vlgmr.msra.gmra.mxu1 %vm263_vm2, %v882_v24 }
 0x7f1   :  { %v957_v29 = vpop.f32.mrf.mxu1 }
 0x7f2   :  { %v958_v30 = vadd.f32 %v957_v29, %v887_v28 }
 0x7f3   :  { %v1229_v31 = vpop.f32.mrf.mxu1 }
 0x7f4   :  { %v961_v32 = vmax.f32 %v958_v30, 0.0 }
 0x7f6   :  { %1239 = vmatmul.mubr.msk.f32.vlgmr.msra.gmra.mxu0 %vm263_vm2, %v961_v32 }
 0x8b6   :  { %v1036_v34 = vpop.f32.mrf.mxu0 }
 0x8b7   :  { %v1037_v35 = vadd.f32 %v1036_v34, %v966_v33 }
 0x8b8   :  { %v1240_v36 = vpop.f32.mrf.mxu0 }
 0x8b9   :  { %1041 = vst.msk [vmem:[#allocation5] sm:$0x1] %vm1040_vm4, %v1037_v35 }
 0x8ba   :  { %1278 = shalt.err (!%p1275_p9)
}
 0x8bb   :  { %1051 = dma.vmem_to_hbm [thread:$0]  %s1049_s1, 16, %s1563_s18, [#allocation4]  }
 0x8bc   :  { %1289 = dma.done.wait [#allocation4], 16  }
 0x8bd   :  { %1290 = vsyncadd [#allocation4], 4294967280 }
 0x8be   :  { %1055 = vsyncpa [#allocation3], 1 }
 0x8bf   :  { %1056 = vsyncpa [#allocation4], 1 }

</bundles_post_ra>
